<compile_context>
chip_gen: v7x
topology: tpu7x:2x2x1
jax: 0.10.0
libtpu: 0.0.40
codegen_flags: <defaults>
</compile_context>

<pallas_src>
import jax
import jax.numpy as jnp
from jax.experimental import pallas as pl
from jax.experimental.pallas import tpu as pltpu


def _round_up(n, m):
    return ((n + m - 1) // m) * m


def node_classifier_kernel(x_ref, w1_ref, b1_ref, w2_ref, b2_ref, out_ref):
    # x tile (tb, 2F*p) f32; packed block-diagonal weights bf16; biases f32.
    x = x_ref[...].astype(jnp.bfloat16)                    # VPU cast, hidden under MXU
    h = jnp.dot(x, w1_ref[...],
                preferred_element_type=jnp.float32)        # MXU, f32 acc
    h = jnp.tanh(h + b1_ref[...])                          # VPU + EUP, f32 (v5e-safe)
    o = jnp.dot(h.astype(jnp.bfloat16), w2_ref[...],
                preferred_element_type=jnp.float32)        # MXU, f32 acc
    out_ref[...] = o + b2_ref[...]


def node_classifier(x, w1, b1, w2, b2, *, block_b=4096, pack=8):
    """Fused forward pass of NodeClassifier.

    x  : (B, 2*feature_size) float32
    w1 : (2*feature_size, hidden_size)
    b1 : (1, hidden_size) or (hidden_size,)
    w2 : (hidden_size, 4)
    b2 : (1, 4) or (4,)
    returns (B, 4) float32

    block_b : batch rows (original, unpacked) per grid step.
    pack    : rows packed into the K/N dims. 8 fills the 256-wide MXU on
              v6e/v7x; also fine on v5e's 128-wide MXU (two K passes).
    """
    B, F2 = x.shape
    H = w1.shape[1]
    O = w2.shape[1]
    p = max(1, int(pack))

    # Pad only to a multiple of p (<= p-1 rows, and only when actually needed).
    Bp = _round_up(B, p)
    if Bp != B:
        x = jnp.pad(x, ((0, Bp - B), (0, 0)))
    n_rows = Bp // p                               # packed rows

    # Free contiguous reshape: packed row r = [x[r*p], ..., x[r*p + p - 1]].
    x_p = x.astype(jnp.float32).reshape(n_rows, F2 * p)

    # Block-diagonal packed weights (bf16 for the MXU) and tiled biases (f32,
    # added to the f32 accumulator).  These are tiny (<= a few hundred KiB).
    eye_p = jnp.eye(p, dtype=jnp.float32)
    w1_blk = jnp.kron(eye_p, w1.astype(jnp.float32)).astype(jnp.bfloat16)   # (2F*p, H*p)
    w2_blk = jnp.kron(eye_p, w2.astype(jnp.float32)).astype(jnp.bfloat16)   # (H*p, O*p)
    b1_blk = jnp.tile(b1.reshape(1, H).astype(jnp.float32), (1, p))         # (1, H*p)
    b2_blk = jnp.tile(b2.reshape(1, O).astype(jnp.float32), (1, p))         # (1, O*p)

    F2p, Hp, Op = F2 * p, H * p, O * p

    # Packed-row tile: multiple of 8 (sublane) or the full packed extent.
    tb = min(n_rows, _round_up(max(block_b // p, 8), 8))
    grid = (pl.cdiv(n_rows, tb),)                  # ragged last block is fine

    flops = 2 * n_rows * (F2p * Hp + Hp * Op)      # actual MXU work (incl. zero blocks)
    bytes_accessed = (x_p.size * 4 + w1_blk.size * 2 + w2_blk.size * 2
                      + b1_blk.size * 4 + b2_blk.size * 4 + n_rows * Op * 4)

    out = pl.pallas_call(
        node_classifier_kernel,
        out_shape=jax.ShapeDtypeStruct((n_rows, Op), jnp.float32),
        grid_spec=pl.GridSpec(
            grid=grid,
            in_specs=[
                pl.BlockSpec((tb, F2p), lambda i: (i, 0)),    # batch-tiled x
                pl.BlockSpec((F2p, Hp), lambda i: (0, 0)),    # weights VMEM-resident
                pl.BlockSpec((1, Hp), lambda i: (0, 0)),
                pl.BlockSpec((Hp, Op), lambda i: (0, 0)),
                pl.BlockSpec((1, Op), lambda i: (0, 0)),
            ],
            out_specs=pl.BlockSpec((tb, Op), lambda i: (i, 0)),
        ),
        compiler_params=pltpu.CompilerParams(
            # Batch axis is fully independent -> megacore-shardable on v7x.
            # TODO(synk): if an xprof trace on v7x shows only one TC busy,
            # switch this axis to pltpu.CORE_PARALLEL (or use pl.core_map).
            dimension_semantics=("parallel",)),
        cost_estimate=pl.CostEstimate(
            flops=flops,
            transcendentals=n_rows * Hp,
            bytes_accessed=bytes_accessed),
    )(x_p, w1_blk, b1_blk, w2_blk, b2_blk)

    # Unpack (n_rows, O*p) -> (Bp, O); drop pad rows (tiny output copy).
    out = out.reshape(Bp, O)
    return out[:B] if Bp != B else out


def init_params(key, feature_size, hidden_size):
    """Deterministic init mimicking nn.Linear's uniform(-1/sqrt(fan_in))."""
    in1 = feature_size * 2
    k1, k2, k3, k4 = jax.random.split(key, 4)
    lim1 = 1.0 / (in1 ** 0.5)
    lim2 = 1.0 / (hidden_size ** 0.5)
    w1 = jax.random.uniform(k1, (in1, hidden_size), jnp.float32, -lim1, lim1)
    b1 = jax.random.uniform(k2, (1, hidden_size), jnp.float32, -lim1, lim1)
    w2 = jax.random.uniform(k3, (hidden_size, 4), jnp.float32, -lim2, lim2)
    b2 = jax.random.uniform(k4, (1, 4), jnp.float32, -lim2, lim2)
    return w1, b1, w2, b2


def _ref_bf16(x, w1, b1, w2, b2):
    # Pure-JAX reference with the same bf16 rounding of x/w1/w2 and h as the
    # kernel path (f32 accumulation) -- isolates kernel correctness.
    xb = x.astype(jnp.bfloat16).astype(jnp.float32)
    w1b = w1.astype(jnp.bfloat16).astype(jnp.float32)
    w2b = w2.astype(jnp.bfloat16).astype(jnp.float32)
    h = jnp.tanh(xb @ w1b + b1).astype(jnp.bfloat16).astype(jnp.float32)
    return h @ w2b + b2


if __name__ == "__main__":
    feature_size = 16   # -> input dim 32
    hidden_size = 32
    batch = 8

    key = jax.random.PRNGKey(0)
    kx, kx2, kp = jax.random.split(key, 3)
    x = jax.random.normal(kx, (batch, feature_size * 2), dtype=jnp.float32)
    w1, b1, w2, b2 = init_params(kp, feature_size, hidden_size)

    out = node_classifier(x, w1, b1, w2, b2)
    out = jax.block_until_ready(out)
    assert out.shape == (batch, 4)

    ref = _ref_bf16(x, w1, b1, w2, b2)
    assert jnp.allclose(out, ref, atol=1e-2, rtol=1e-2), (
        float(jnp.max(jnp.abs(out - ref))))

    # Looser check against pure-f32 PyTorch-equivalent math (kernel uses bf16
    # activations/weights with f32 accumulation).
    ref_f32 = jnp.tanh(x @ w1 + b1) @ w2 + b2
    assert jnp.allclose(out, ref_f32, atol=5e-2, rtol=5e-2), (
        float(jnp.max(jnp.abs(out - ref_f32))))

    # Exercise a multi-step grid with a ragged last block (25 packed rows,
    # tb = 8 packed rows -> grid of 4, last block partially out of range).
    batch2 = 200
    x2 = jax.random.normal(kx2, (batch2, feature_size * 2), dtype=jnp.float32)
    out2 = jax.block_until_ready(
        node_classifier(x2, w1, b1, w2, b2, block_b=64))
    assert out2.shape == (batch2, 4)
    ref2 = _ref_bf16(x2, w1, b1, w2, b2)
    assert jnp.allclose(out2, ref2, atol=1e-2, rtol=1e-2), (
        float(jnp.max(jnp.abs(out2 - ref2))))

    print("KERNEL_OK")
</pallas_src>

<mosaic_0001>
module attributes {stable_mosaic.version = 11 : i64} {
  func.func @node_classifier_kernel(%arg0: i32, %arg1: memref<1x256xf32, #tpu.memory_space<vmem>>, %arg2: memref<256x256xbf16, #tpu.memory_space<vmem>>, %arg3: memref<1x256xf32, #tpu.memory_space<vmem>>, %arg4: memref<256x32xbf16, #tpu.memory_space<vmem>>, %arg5: memref<1x32xf32, #tpu.memory_space<vmem>>, %arg6: memref<1x32xf32, #tpu.memory_space<vmem>>) attributes {dimension_semantics = [#tpu.dimension_semantics<parallel>], iteration_bounds = array<i64: 1>, scalar_prefetch = 0 : i64, scratch_operands = 0 : i64, tpu.core_type = #tpu.core_type<tc>, window_params = [{transform_indices = @transform_0, window_bounds = array<i64: 1, 256>}, {pipeline_mode = #tpu.pipeline_mode<synchronous>, transform_indices = @transform_1, window_bounds = array<i64: 256, 256>}, {pipeline_mode = #tpu.pipeline_mode<synchronous>, transform_indices = @transform_2, window_bounds = array<i64: 1, 256>}, {pipeline_mode = #tpu.pipeline_mode<synchronous>, transform_indices = @transform_3, window_bounds = array<i64: 256, 32>}, {pipeline_mode = #tpu.pipeline_mode<synchronous>, transform_indices = @transform_4, window_bounds = array<i64: 1, 32>}, {transform_indices = @transform_5, window_bounds = array<i64: 1, 32>}]} {
    %c0 = arith.constant 0 : index
    %c0_0 = arith.constant 0 : index
    %0 = vector.load %arg1[%c0, %c0_0] : memref<1x256xf32, #tpu.memory_space<vmem>>, vector<1x256xf32>
    %1 = arith.truncf %0 : vector<1x256xf32> to vector<1x256xbf16>
    %c0_1 = arith.constant 0 : index
    %c0_2 = arith.constant 0 : index
    %2 = vector.load %arg2[%c0_1, %c0_2] : memref<256x256xbf16, #tpu.memory_space<vmem>>, vector<256x256xbf16>
    %cst = arith.constant dense<0.000000e+00> : vector<1x256xf32>
    %3 = tpu.matmul %1, %2, %cst {dimension_numbers = #tpu.dot_dimension_numbers<[1], [0], [0], [1], [0, 0, 1, 1], [], []>} : vector<1x256xbf16>, vector<256x256xbf16>, vector<1x256xf32> -> vector<1x256xf32>
    %c0_3 = arith.constant 0 : index
    %c0_4 = arith.constant 0 : index
    %4 = vector.load %arg3[%c0_3, %c0_4] : memref<1x256xf32, #tpu.memory_space<vmem>>, vector<1x256xf32>
    %5 = arith.addf %3, %4 : vector<1x256xf32>
    %6 = math.tanh %5 : vector<1x256xf32>
    %7 = arith.truncf %6 : vector<1x256xf32> to vector<1x256xbf16>
    %c0_5 = arith.constant 0 : index
    %c0_6 = arith.constant 0 : index
    %8 = vector.load %arg4[%c0_5, %c0_6] : memref<256x32xbf16, #tpu.memory_space<vmem>>, vector<256x32xbf16>
    %cst_7 = arith.constant dense<0.000000e+00> : vector<1x32xf32>
    %9 = tpu.matmul %7, %8, %cst_7 {dimension_numbers = #tpu.dot_dimension_numbers<[1], [0], [0], [1], [0, 0, 1, 1], [], []>} : vector<1x256xbf16>, vector<256x32xbf16>, vector<1x32xf32> -> vector<1x32xf32>
    %c0_8 = arith.constant 0 : index
    %c0_9 = arith.constant 0 : index
    %10 = vector.load %arg5[%c0_8, %c0_9] : memref<1x32xf32, #tpu.memory_space<vmem>>, vector<1x32xf32>
    %11 = arith.addf %9, %10 : vector<1x32xf32>
    %c0_10 = arith.constant 0 : index
    %c0_11 = arith.constant 0 : index
    %12 = vector.load %arg6[%c0_10, %c0_11] : memref<1x32xf32, #tpu.memory_space<vmem>>, vector<1x32xf32>
    tpu.vector_store %arg6[%c0_10, %c0_11], %11 {strides = array<i32>} : memref<1x32xf32, #tpu.memory_space<vmem>>, vector<1x32xf32>,
    return
  }
  func.func @transform_0(%arg0: i32) -> (i32, i32) {
    %c0_i32 = arith.constant 0 : i32
    %c0_i32_0 = arith.constant 0 : i32
    return %arg0, %c0_i32 : i32, i32
  }
  func.func @transform_1(%arg0: i32) -> (i32, i32) {
    %c0_i32 = arith.constant 0 : i32
    %c0_i32_0 = arith.constant 0 : i32
    %c0_i32_1 = arith.constant 0 : i32
    return %c0_i32, %c0_i32_0 : i32, i32
  }
  func.func @transform_2(%arg0: i32) -> (i32, i32) {
    %c0_i32 = arith.constant 0 : i32
    %c0_i32_0 = arith.constant 0 : i32
    %c0_i32_1 = arith.constant 0 : i32
    return %c0_i32, %c0_i32_0 : i32, i32
  }
  func.func @transform_3(%arg0: i32) -> (i32, i32) {
    %c0_i32 = arith.constant 0 : i32
    %c0_i32_0 = arith.constant 0 : i32
    %c0_i32_1 = arith.constant 0 : i32
    return %c0_i32, %c0_i32_0 : i32, i32
  }
  func.func @transform_4(%arg0: i32) -> (i32, i32) {
    %c0_i32 = arith.constant 0 : i32
    %c0_i32_0 = arith.constant 0 : i32
    %c0_i32_1 = arith.constant 0 : i32
    return %c0_i32, %c0_i32_0 : i32, i32
  }
  func.func @transform_5(%arg0: i32) -> (i32, i32) {
    %c0_i32 = arith.constant 0 : i32
    %c0_i32_0 = arith.constant 0 : i32
    return %arg0, %c0_i32 : i32, i32
  }
}

</mosaic_0001>

<bundles_post_ra>
// kernel: tpu_custom_call.1
= control target key start
LH: loop header
LB: loop body
LE: loop exit
PB: predicated region body
PF: predicated region fallthrough
CT: control target
= control target key end

     0   :  { %10 = vsyncpa [#allocation3], 0  ;;  %s798_s0 = inlined_call_operand.vmem [shape: f32[1,256], index: 0, kind: input, shape index: {}]   ;;  %s799_s1 = inlined_call_operand.hbm [shape: bf16[256,256], index: 1, kind: input, shape index: {}]   ;;  %s800_s2 = inlined_call_operand.vmem [shape: f32[1,256], index: 2, kind: input, shape index: {}]   ;;  %s801_s3 = inlined_call_operand.vmem [shape: bf16[256,32], index: 3, kind: input, shape index: {}]   ;;  %s802_s4 = inlined_call_operand.vmem [shape: f32[1,32], index: 4, kind: input, shape index: {}]   ;;  %s803_s5 = inlined_call_operand.hbm [shape: f32[1,32], index: 5, kind: output, shape index: {}]  }
   0x1   :  { %11 = vsyncpa [#allocation4], 0  ;;  %s675_s18 = smov [#allocation2]   ;;  %s627_s22 = scalar_lea.hbm %s799_s1, 4096 }
   0x2   :  { %s19_s19 = sshll.u32 %s675_s18, 4  ;;  %p628_p0 = scmp.ne.s32.totalorder %s799_s1, %s627_s22  ;;  %s20_s19 = int_to_ptr.vmem [resolvable:$true] %s19_s19 }
   0x3   :  { %p631_p1 = scmp.lt.u32.totalorder %s627_s22, %s799_s1 }
   0x5   :  { %p633_p2 = pnand %p631_p1, %p628_p0 }
   0x7   :  { %636 = shalt.err (!%p633_p2)
}
   0x8   :  { %s637_s27 = scalar_lea.vmem %s20_s19, 4096  ;;  %p642_p4 = scmp.lt.s32.totalorder %s20_s19, %s20_s19 }
   0x9   :  { %p638_p3 = scmp.ne.s32.totalorder %s20_s19, %s637_s27  ;;  %p643_p5 = scmp.lt.s32.totalorder %s637_s27, %s637_s27 }
   0xb   :  { %p644_p6 = por %p643_p5, %p642_p4 }
   0xd   :  { %p645_p7 = pnand %p644_p6, %p638_p3 }
   0xf   :  { %648 = shalt.err (!%p645_p7)
}
  0x10   :  { %s676_s28 = smov 128   ;;  %s677_s29 = smov 8  }
  0x11   :  { %25 = dma.hbm_to_vmem [thread:$0]  %s799_s1, 4096, %s20_s19, [#allocation3], %s676_s28, %s676_s28, %s677_s29  }
  0x12   :  { %671 = dma.done.wait [#allocation3], 4096  }
  0x13   :  { %672 = vsyncadd [#allocation3], 4294963200  ;;  %v559_v0 = vld [vmem:[#allocation2 + $0x4] ss:$8 sps:$4 sm:$0xff]   ;;  %v561_v1 = vld [vmem:[#allocation2] ss:$8 sps:$4 sm:$0xff]   ;;  %v38_v7 = vlaneseq }
  0x14   :  { %254 = vmatprep.subr.bf16.mxu0 %v559_v0  ;;  %v562_v2 = vld [vmem:[#allocation2 + $0x14] ss:$8 sps:$4 sm:$0xff]   ;;  %v564_v3 = vld [vmem:[#allocation2 + $0x10] ss:$8 sps:$4 sm:$0xff]   ;;  %v565_v4 = vld [vmem:[#allocation2 + $0x24] ss:$8 sps:$4 sm:$0xff]  }
  0x15   :  { %255 = vmatpush1.bf16.msra.mxu0 %v561_v1  ;;  %v567_v5 = vld [vmem:[#allocation2 + $0x20] ss:$8 sps:$4 sm:$0xff]   ;;  %v568_v6 = vld [vmem:[#allocation2 + $0x34] ss:$8 sps:$4 sm:$0xff]   ;;  %v570_v8 = vld [vmem:[#allocation2 + $0x30] ss:$8 sps:$4 sm:$0xff]  }
  0x16   :  { %256 = vmatprep.subr.bf16.mxu0 %v562_v2  ;;  %v571_v9 = vld [vmem:[#allocation2 + $0x44] ss:$8 sps:$4 sm:$0xff]   ;;  %v721_v10 = vshrl.u32 %v38_v7, 7  ;;  %v573_v11 = vld [vmem:[#allocation2 + $0x40] ss:$8 sps:$4 sm:$0xff]   ;;  %v611_v25 = vld [vmem:[%s801_s3 + $0x50] sm:$0xff]  }
  0x17   :  { %v574_v12 = vld [vmem:[#allocation2 + $0x54] ss:$8 sps:$4 sm:$0xff]   ;;  %v576_v14 = vld [vmem:[#allocation2 + $0x50] ss:$8 sps:$4 sm:$0xff]   ;;  %v577_v15 = vld [vmem:[#allocation2 + $0x64] ss:$8 sps:$4 sm:$0xff]  }
  0x18   :  { %v44_v13 = vsub.s32 1, %v721_v10  ;;  %v579_v16 = vld [vmem:[#allocation2 + $0x60] ss:$8 sps:$4 sm:$0xff]   ;;  %v580_v18 = vld [vmem:[#allocation2 + $0x74] ss:$8 sps:$4 sm:$0xff]   ;;  %v40_v43 = vsub.s32 0, %v721_v10 }
  0x19   :  { %257 = vmatpush1.bf16.msra.mxu0 %v564_v3  ;;  %v36_v17 = vld [vmem:[%s798_s0] sm:$0x3]  ;;  %v609_v23 = vld [vmem:[%s801_s3 + $0x48] sm:$0xff]   ;;  %v582_v26 = vld [vmem:[#allocation2 + $0x70] ss:$8 sps:$4 sm:$0xff]   ;;  %s678_s14 = smov [#allocation5]  }
  0x1a   :  { %258 = vmatprep.subr.bf16.mxu0 %v565_v4  ;;  %v45_v19 = vrot.slane %v36_v17, %v44_v13  ;;  %v607_v20 = vld [vmem:[%s801_s3 + $0x40] sm:$0xff]   ;;  %v610_v24 = vld [vmem:[%s801_s3 + $0x8] sm:$0xff]   ;;  %v612_v29 = vld [vmem:[%s801_s3 + $0x10] sm:$0xff]   ;;  %v41_v46 = vrot.slane %v36_v17, %v40_v43  ;;  %s476_s15 = sshll.u32 %s678_s14, 4  ;;  %vm468_vm0 = vcmask 253952   ;;  %s477_s15 = int_to_ptr.vmem [resolvable:$true] %s476_s15 }
  0x1b   :  { %v608_v21 = vld [vmem:[%s801_s3] sm:$0xff]   ;;  %533 = vmatprep.subr.bf16.mxu1 %v607_v20  ;;  %v613_v30 = vld [vmem:[%s801_s3 + $0x58] sm:$0xff]   ;;  %v617_v51 = vld [vmem:[%s801_s3 + $0x68] sm:$0xff]   ;;  %s649_s16 = scalar_lea.vmem %s477_s15, 16  ;;  %s653_s17 = scalar_lea.vmem %s477_s15, 32 }
  0x1c   :  { %v49_v22 = vpack.c.bf16 %v45_v19, %v45_v19  ;;  %534 = vmatpush3.bf16.msra.mxu1 %v608_v21  ;;  %v583_v27 = vld [vmem:[#allocation2 + $0x84] ss:$8 sps:$4 sm:$0xff]   ;;  %v585_v28 = vld [vmem:[#allocation2 + $0x80] ss:$8 sps:$4 sm:$0xff]   ;;  %v586_v31 = vld [vmem:[#allocation2 + $0x94] ss:$8 sps:$4 sm:$0xff]   ;;  %v48_v48 = vpack.c.bf16 %v41_v46, %v41_v46  ;;  %p650_p8 = scmp.ne.s32.totalorder %s477_s15, %s649_s16  ;;  %p654_p9 = scmp.lt.s32.totalorder %s477_s15, %s477_s15 }
  0x1d   :  { %259 = vmatpush1.bf16.msra.mxu0 %v567_v5  ;;  %535 = vmatprep.subr.bf16.mxu1 %v609_v23  ;;  %v614_v32 = vld [vmem:[%s801_s3 + $0x18] sm:$0xff]   ;;  %v589_v34 = vld [vmem:[#allocation2 + $0xa4] ss:$8 sps:$4 sm:$0xff]   ;;  %v591_v35 = vld [vmem:[#allocation2 + $0xa0] ss:$8 sps:$4 sm:$0xff]   ;;  %p655_p10 = scmp.lt.s32.totalorder %s653_s17, %s649_s16 }
  0x1e   :  { %260 = vmatprep.subr.bf16.mxu0 %v568_v6  ;;  %286 = vmatprep.mubr.bf16.mxu0 %v49_v22  ;;  %v588_v33 = vld [vmem:[#allocation2 + $0x90] ss:$8 sps:$4 sm:$0xff]   ;;  %v592_v36 = vld [vmem:[#allocation2 + $0xb4] ss:$8 sps:$4 sm:$0xff]   ;;  %v595_v38 = vld [vmem:[#allocation2 + $0xc4] ss:$8 sps:$4 sm:$0xff]  }
  0x1f   :  { %v594_v37 = vld [vmem:[#allocation2 + $0xb0] ss:$8 sps:$4 sm:$0xff]   ;;  %v597_v39 = vld [vmem:[#allocation2 + $0xc0] ss:$8 sps:$4 sm:$0xff]   ;;  %v598_v40 = vld [vmem:[#allocation2 + $0xd4] ss:$8 sps:$4 sm:$0xff]   ;;  %p656_p11 = por %p655_p10, %p654_p9 }
  0x20   :  { %536 = vmatpush3.bf16.msra.mxu1 %v610_v24  ;;  %v600_v41 = vld [vmem:[#allocation2 + $0xd0] ss:$8 sps:$4 sm:$0xff]   ;;  %v601_v42 = vld [vmem:[#allocation2 + $0xe4] ss:$8 sps:$4 sm:$0xff]   ;;  %v603_v44 = vld [vmem:[#allocation2 + $0xe0] ss:$8 sps:$4 sm:$0xff]  }
  0x21   :  { %261 = vmatpush1.bf16.msra.mxu0 %v570_v8  ;;  %537 = vmatprep.subr.bf16.mxu1 %v611_v25  ;;  %v604_v45 = vld [vmem:[#allocation2 + $0xf4] ss:$8 sps:$4 sm:$0xff]   ;;  %v606_v47 = vld [vmem:[#allocation2 + $0xf0] ss:$8 sps:$4 sm:$0xff]   ;;  %v615_v49 = vld [vmem:[%s801_s3 + $0x60] sm:$0xff]   ;;  %p657_p12 = pnand %p656_p11, %p650_p8 }
  0x22   :  { %262 = vmatprep.subr.bf16.mxu0 %v571_v9  ;;  %v616_v50 = vld [vmem:[%s801_s3 + $0x20] sm:$0xff]   ;;  %v618_v52 = vld [vmem:[%s801_s3 + $0x28] sm:$0xff]   ;;  %v619_v53 = vld [vmem:[%s801_s3 + $0x70] sm:$0xff]  }
  0x23   :  { %v620_v54 = vld [vmem:[%s801_s3 + $0x30] sm:$0xff]   ;;  %v621_v55 = vld [vmem:[%s801_s3 + $0x78] sm:$0xff]   ;;  %v82_v57 = vld [vmem:[%s800_s2] sm:$0x3] }
  0x24   :  { %538 = vmatpush3.bf16.msra.mxu1 %v612_v29  ;;  %v622_v56 = vld [vmem:[%s801_s3 + $0x38] sm:$0xff]   ;;  %v247_v58 = vrot.slane %v82_v57, %v40_v43  ;;  %v251_v59 = vrot.slane %v82_v57, %v44_v13  ;;  %v331_v7 = vld [vmem:[%s802_s4] sm:$0x1] }
  0x25   :  { %263 = vmatpush1.bf16.msra.mxu0 %v573_v11  ;;  %539 = vmatprep.subr.bf16.mxu1 %v613_v30 }
  0x26   :  { %264 = vmatprep.subr.bf16.mxu0 %v574_v12 }
  0x28   :  { %540 = vmatpush3.bf16.msra.mxu1 %v614_v32 }
  0x29   :  { %265 = vmatpush1.bf16.msra.mxu0 %v576_v14  ;;  %541 = vmatprep.subr.bf16.mxu1 %v615_v49 }
  0x2a   :  { %266 = vmatprep.subr.bf16.mxu0 %v577_v15 }
  0x2c   :  { %542 = vmatpush3.bf16.msra.mxu1 %v616_v50 }
  0x2d   :  { %267 = vmatpush1.bf16.msra.mxu0 %v579_v16  ;;  %543 = vmatprep.subr.bf16.mxu1 %v617_v51 }
  0x2e   :  { %268 = vmatprep.subr.bf16.mxu0 %v580_v18 }
  0x30   :  { %544 = vmatpush3.bf16.msra.mxu1 %v618_v52 }
  0x31   :  { %269 = vmatpush1.bf16.msra.mxu0 %v582_v26  ;;  %545 = vmatprep.subr.bf16.mxu1 %v619_v53 }
  0x32   :  { %270 = vmatprep.subr.bf16.mxu0 %v583_v27 }
  0x34   :  { %546 = vmatpush3.bf16.msra.mxu1 %v620_v54 }
  0x35   :  { %271 = vmatpush1.bf16.msra.mxu0 %v585_v28  ;;  %547 = vmatprep.subr.bf16.mxu1 %v621_v55 }
  0x36   :  { %272 = vmatprep.subr.bf16.mxu0 %v586_v31 }
  0x38   :  { %548 = vmatpush3.bf16.msra.mxu1 %v622_v56 }
  0x39   :  { %273 = vmatpush1.bf16.msra.mxu0 %v588_v33 }
  0x3a   :  { %274 = vmatprep.subr.bf16.mxu0 %v589_v34 }
  0x3d   :  { %275 = vmatpush1.bf16.msra.mxu0 %v591_v35 }
  0x3e   :  { %276 = vmatprep.subr.bf16.mxu0 %v592_v36 }
  0x41   :  { %277 = vmatpush1.bf16.msra.mxu0 %v594_v37 }
  0x42   :  { %278 = vmatprep.subr.bf16.mxu0 %v595_v38 }
  0x45   :  { %279 = vmatpush1.bf16.msra.mxu0 %v597_v39 }
  0x46   :  { %280 = vmatprep.subr.bf16.mxu0 %v598_v40 }
  0x49   :  { %281 = vmatpush1.bf16.msra.mxu0 %v600_v41 }
  0x4a   :  { %282 = vmatprep.subr.bf16.mxu0 %v601_v42 }
  0x4d   :  { %283 = vmatpush1.bf16.msra.mxu0 %v603_v44 }
  0x4e   :  { %284 = vmatprep.subr.bf16.mxu0 %v604_v45 }
  0x51   :  { %285 = vmatpush1.bf16.msra.mxu0 %v606_v47 }
  0x54   :  { %287 = vmatmul.mubr.bf16.vlgmr.msra.gmra.mrb[0].mxu0 %v48_v48 }
 0x127   :  { %v288_v60 = vpop.f32.mrb[0].mxu0 }
 0x128   :  { %v289_v61 = vadd.f32 %v288_v60, %v247_v58  ;;  %v290_v62 = vpop.f32.mrb[1].mxu0 }
 0x129   :  { %v291_v63 = vadd.f32 %v290_v62, %v251_v59  ;;  %v292_v0 = vpop.f32.mrb[2].mxu0 }
 0x12a   :  { %623 = vtanh.f32 %v289_v61  ;;  %v293_v1 = vpop.f32.mrb[3].mxu0 }
 0x12b   :  { %625 = vtanh.f32 %v291_v63 }
 0x134   :  { %v624_v2 = vpop.eup %623 }
 0x135   :  { %v626_v3 = vpop.eup %625  ;;  %v297_v5 = vpack.c.bf16 %v624_v2, %v624_v2 }
 0x136   :  { %v298_v4 = vpack.c.bf16 %v626_v3, %v626_v3 }
 0x138   :  { %460 = vmatprep.mubr.bf16.mxu1 %v298_v4 }
 0x139   :  { %461 = vmatmul.mubr.bf16.vlgmr.msra.gmra.mrb[0].mxu1 %v297_v5 }
 0x20c   :  { %v549_v6 = vpop.f32.mrb[0].mxu1 }
 0x20d   :  { %v550_v8 = vpop.f32.mrb[1].mxu1 }
 0x20e   :  { %v551_v9 = vadd.f32 %v550_v8, %v549_v6  ;;  %v552_v10 = vpop.f32.mrb[2].mxu1 }
 0x20f   :  { %v553_v11 = vpop.f32.mrb[3].mxu1 }
 0x210   :  { %v463_v12 = vadd.f32 %v551_v9, %v331_v7 }
 0x212   :  { %469 = vst.msk [vmem:[#allocation5] sm:$0x1] %vm468_vm0, %v463_v12 }
 0x213   :  { %660 = shalt.err (!%p657_p12)
}
 0x214   :  { %s661_s19 = scalar_lea.hbm %s803_s5, 16 }
 0x215   :  { %p662_p13 = scmp.ne.s32.totalorder %s803_s5, %s661_s19  ;;  %p665_p0 = scmp.lt.u32.totalorder %s661_s19, %s803_s5 }
 0x217   :  { %p667_p1 = pnand %p665_p0, %p662_p13 }
 0x219   :  { %670 = shalt.err (!%p667_p1)
}
 0x21a   :  { %479 = dma.vmem_to_hbm [thread:$0]  %s477_s15, 16, %s803_s5, [#allocation4]  }
 0x21b   :  { %673 = dma.done.wait [#allocation4], 16  }
 0x21c   :  { %674 = vsyncadd [#allocation4], 4294967280 }
 0x21d   :  { %483 = vsyncpa [#allocation3], 1 }
 0x21e   :  { %484 = vsyncpa [#allocation4], 1 }

</bundles_post_ra>
